<compile_context>
chip_gen: v7x
topology: tpu7x:2x2x1
jax: 0.10.0
libtpu: 0.0.40
codegen_flags: <defaults>
</compile_context>

<pallas_src>
import functools
import math

import jax
import jax.numpy as jnp
from jax.experimental import pallas as pl
from jax.experimental.pallas import tpu as pltpu


def _round_up(x, m):
    return (x + m - 1) // m * m


def _default_bf16_exp():
    # bf16 EUP (exp) only exists on v6e/v7x; keep softmax math in f32 on v5e/older.
    try:
        kind = jax.devices()[0].device_kind.lower()
    except Exception:
        return False
    return not any(v in kind for v in ("v2", "v3", "v4", "v5"))


def _proxy_nca_kernel(emb_ref, prox_ref, lab_ref, out_ref,
                      m_ref, l_ref, labacc_ref, *,
                      logit_scale, num_classes, num_valid,
                      mask_classes, mask_rows, use_bf16_exp):
    i = pl.program_id(0)                 # batch tile (parallel)
    j = pl.program_id(1)                 # class tile (reduction)
    tile_n = out_ref.shape[0]
    tile_c = prox_ref.shape[0]

    # ---- init per-batch-tile state on the first class tile -------------------
    @pl.when(j == 0)
    def _init():
        m_ref[...] = jnp.full_like(m_ref, -jnp.inf)
        l_ref[...] = jnp.zeros_like(l_ref)
        labacc_ref[...] = jnp.zeros_like(labacc_ref)

    # ---- cosine similarity on the MXU (bf16 in, f32 accumulate) --------------
    # 2*scale is pre-folded into the proxies when exact, so `sim` is already the
    # logit tile in that case (logit_scale == 1.0 is a trace-time constant).
    sim = jax.lax.dot_general(
        emb_ref[...], prox_ref[...], (((1,), (1,)), ((), ())),
        preferred_element_type=jnp.float32)                               # (TN, TC)
    logits = sim if logit_scale == 1.0 else logit_scale * sim

    col = jax.lax.broadcasted_iota(jnp.int32, (1, tile_c), 1)             # (1, TC)

    # Mask zero-padded classes out of the softmax denominator (skipped at trace
    # time when num_classes == c_pad). Single-row mask, broadcast add.
    if mask_classes:
        neg = jnp.where(col < (num_classes - j * tile_c), 0.0, -1e30)     # (1, TC)
        logits_m = logits + neg
    else:
        logits_m = logits

    # ---- online logsumexp over class tiles ------------------------------------
    m_old = m_ref[...]
    m_new = jnp.maximum(m_old, jnp.max(logits_m, axis=1, keepdims=True))
    shifted = logits_m - m_new
    if use_bf16_exp:
        s = jnp.sum(jnp.exp(shifted.astype(jnp.bfloat16)),
                    axis=1, keepdims=True, dtype=jnp.float32)
    else:
        s = jnp.sum(jnp.exp(shifted), axis=1, keepdims=True)
    l_ref[...] = jnp.exp(m_old - m_new) * l_ref[...] + s
    m_ref[...] = m_new

    # ---- accumulate the label-class logit (true class hits exactly one tile) --
    hit = col == (lab_ref[...] - j * tile_c)                              # (TN, TC)
    labacc_ref[...] += jnp.sum(jnp.where(hit, logits, 0.0), axis=1, keepdims=True)

    # ---- finalize on the last class tile ---------------------------------------
    @pl.when(j == pl.num_programs(1) - 1)
    def _finalize():
        per = m_ref[...] + jnp.log(l_ref[...]) - labacc_ref[...]          # (TN, 1)
        if mask_rows:
            row = i * tile_n + jax.lax.broadcasted_iota(jnp.int32, per.shape, 0)
            per = jnp.where(row < num_valid, per, 0.0)                    # zero padded rows
        out_ref[...] = per


def _proxy_nca_loss_xla(embeddings, proxies, labels, scale):
    # Fused XLA path for tiny problems (cheaper than a padded single-step kernel).
    e = embeddings.astype(jnp.float32)
    e = e * jax.lax.rsqrt(jnp.maximum(jnp.sum(e * e, axis=1, keepdims=True), 1e-24))
    p = proxies.astype(jnp.float32)
    p = p * jax.lax.rsqrt(jnp.maximum(jnp.sum(p * p, axis=1, keepdims=True), 1e-24))
    logits = (2.0 * float(scale)) * jnp.dot(e, p.T)
    logp = jax.nn.log_softmax(logits, axis=1)
    per = -jnp.take_along_axis(logp, labels.astype(jnp.int32)[:, None], axis=1)[:, 0]
    return jnp.mean(per)


def proxy_nca_loss(embeddings, proxies, labels, scale=32.0, *,
                   tile_n=None, tile_c=None, use_pallas=None, use_bf16_exp=None):
    """ProxyNCA loss. embeddings (N, D), proxies (C, D), labels (N,) int -> scalar f32."""
    n, d = embeddings.shape
    c, d2 = proxies.shape
    assert d == d2, "embedding / proxy dims must match"
    scale = float(scale)

    if use_pallas is None:
        # Tiny problems: padding + launch overhead dominate; use fused XLA instead.
        use_pallas = (n * c) >= (64 * 1024)
    if not use_pallas:
        return _proxy_nca_loss_xla(embeddings, proxies, labels, scale)

    if use_bf16_exp is None:
        use_bf16_exp = _default_bf16_exp()

    d_pad = _round_up(d, 128)

    # Batch tile: as large as reasonable (dominant lever on proxy re-streaming),
    # 256-capped so the (TN, TC) f32 temporaries stay small.
    # NOTE: on v7x (2 TensorCores) prefer an explicit tile_n ~= n_pad // 2 when
    # n > 256 is a single tile, so the "parallel" axis spans both cores.
    if tile_n is None:
        tile_n = _round_up(n, 8) if n <= 256 else 256
    else:
        tile_n = _round_up(int(tile_n), 8)
    n_pad = _round_up(n, tile_n)

    # Class tile: whole class range as a single (resident) tile when small enough,
    # otherwise stream 256-class tiles.
    if tile_c is None:
        tile_c = _round_up(c, 8) if c <= 512 else 256
    else:
        tile_c = _round_up(int(tile_c), 8)
    c_pad = _round_up(c, tile_c)

    # Fold the constant 2*scale into the proxies when it is a power of two (exact);
    # otherwise keep the f32 multiply in-kernel to avoid extra bf16 rounding.
    two_scale = 2.0 * scale
    mant = math.frexp(two_scale)[0] if two_scale > 0.0 else 0.0
    fold_scale = (two_scale > 0.0) and (mant == 0.5)

    # Proxies: L2-normalize (+ optional scale fold) once in XLA, zero-pad, bf16.
    p = proxies.astype(jnp.float32)
    p = p * jax.lax.rsqrt(jnp.maximum(jnp.sum(p * p, axis=1, keepdims=True), 1e-24))
    if fold_scale:
        p = p * two_scale
    p = jnp.pad(p, ((0, c_pad - c), (0, d_pad - d))).astype(jnp.bfloat16)

    # Embeddings: L2-normalize once in XLA, zero-pad, bf16 (halves the DMA vs f32
    # and removes the per-batch-tile in-kernel normalization pass).
    # TODO(synk): pml would propagate NaN/inf for genuinely zero-norm rows; the
    # 1e-24 guard maps them to zero similarity instead (benign for padded rows).
    e = embeddings.astype(jnp.float32)
    e = e * jax.lax.rsqrt(jnp.maximum(jnp.sum(e * e, axis=1, keepdims=True), 1e-24))
    e = jnp.pad(e, ((0, n_pad - n), (0, d_pad - d))).astype(jnp.bfloat16)

    lab = jnp.pad(labels.astype(jnp.int32), (0, n_pad - n)).reshape(n_pad, 1)

    kernel = functools.partial(
        _proxy_nca_kernel,
        logit_scale=1.0 if fold_scale else two_scale,
        num_classes=c, num_valid=n,
        mask_classes=(c_pad != c), mask_rows=(n_pad != n),
        use_bf16_exp=bool(use_bf16_exp))

    per_elem = pl.pallas_call(
        kernel,
        out_shape=jax.ShapeDtypeStruct((n_pad, 1), jnp.float32),
        grid=(n_pad // tile_n, c_pad // tile_c),
        in_specs=[
            pl.BlockSpec((tile_n, d_pad), lambda i, j: (i, 0)),   # embeddings (resident per batch tile)
            pl.BlockSpec((tile_c, d_pad), lambda i, j: (j, 0)),   # proxies (streamed; resident if 1 class tile)
            pl.BlockSpec((tile_n, 1), lambda i, j: (i, 0)),       # labels (resident per batch tile)
        ],
        out_specs=pl.BlockSpec((tile_n, 1), lambda i, j: (i, 0)),
        scratch_shapes=[
            pltpu.VMEM((tile_n, 1), jnp.float32),                 # running max
            pltpu.VMEM((tile_n, 1), jnp.float32),                 # running sum-exp
            pltpu.VMEM((tile_n, 1), jnp.float32),                 # label logit
        ],
        compiler_params=pltpu.CompilerParams(
            dimension_semantics=("parallel", "arbitrary"),
            vmem_limit_bytes=64 * 1024 * 1024),
    )(e, p, lab)

    # MeanReducer over batch elements (padded rows already zeroed in-kernel).
    # TODO(synk): pml's reducer config can drop exactly-zero per-element losses /
    # apply miner weights; with the default ProxyNCALoss config this is a plain mean.
    return jnp.sum(per_elem) / float(n)


def _reference_loss(embeddings, proxies, labels, scale):
    e = embeddings / jnp.linalg.norm(embeddings, axis=1, keepdims=True)
    p = proxies / jnp.linalg.norm(proxies, axis=1, keepdims=True)
    d2 = jnp.sum((e[:, None, :] - p[None, :, :]) ** 2, axis=-1)
    logp = jax.nn.log_softmax(-scale * d2, axis=1)
    per = -logp[jnp.arange(e.shape[0]), labels]
    return jnp.mean(per)


def _reference_loss_bf16(embeddings, proxies, labels, scale):
    # Same math, but with normalized operands rounded to bf16 before the similarity
    # matmul, mirroring the kernel's MXU input precision (f32 accumulation).
    e = embeddings / jnp.linalg.norm(embeddings, axis=1, keepdims=True)
    p = proxies / jnp.linalg.norm(proxies, axis=1, keepdims=True)
    e = e.astype(jnp.bfloat16).astype(jnp.float32)
    p = p.astype(jnp.bfloat16).astype(jnp.float32)
    sim = jnp.dot(e, p.T, precision=jax.lax.Precision.HIGHEST)
    logp = jax.nn.log_softmax(2.0 * scale * sim, axis=1)
    per = -logp[jnp.arange(e.shape[0]), labels]
    return jnp.mean(per)


if __name__ == "__main__":
    # Module config (synthetic, deterministic init — no checkpoint load).
    nb_classes, sz_embed, scale = 32, 64, 32
    batch = 8

    key = jax.random.PRNGKey(0)
    k_emb, k_prox, k_lab = jax.random.split(key, 3)
    embeddings = jax.random.normal(k_emb, (batch, sz_embed), dtype=jnp.float32)
    proxies = jax.random.normal(k_prox, (nb_classes, sz_embed), dtype=jnp.float32)
    labels = jax.random.randint(k_lab, (batch,), 0, nb_classes, dtype=jnp.int32)

    # Force the Pallas path (auto-dispatch would route this tiny problem to XLA).
    loss = proxy_nca_loss(embeddings, proxies, labels, scale=scale, use_pallas=True)
    loss = jax.block_until_ready(loss)

    ref_bf16 = _reference_loss_bf16(embeddings, proxies, labels, float(scale))
    ref_f32 = _reference_loss(embeddings, proxies, labels, float(scale))
    assert jnp.allclose(loss, ref_bf16, atol=1e-2, rtol=1e-2), (loss, ref_bf16)
    assert jnp.allclose(loss, ref_f32, atol=5e-2, rtol=5e-2), (loss, ref_f32)

    # Multi-tile config: exercises class masking, row masking, class-tile streaming,
    # multiple batch tiles and the non-power-of-two-scale (in-kernel multiply) path.
    n2, c2, d2, s2 = 200, 300, 96, 16.5
    k1, k2, k3 = jax.random.split(jax.random.PRNGKey(1), 3)
    emb2 = jax.random.normal(k1, (n2, d2), dtype=jnp.float32)
    prox2 = jax.random.normal(k2, (c2, d2), dtype=jnp.float32)
    lab2 = jax.random.randint(k3, (n2,), 0, c2, dtype=jnp.int32)
    loss2 = proxy_nca_loss(emb2, prox2, lab2, scale=s2, use_pallas=True,
                           tile_n=64, tile_c=128)
    loss2 = jax.block_until_ready(loss2)
    ref2_bf16 = _reference_loss_bf16(emb2, prox2, lab2, float(s2))
    ref2_f32 = _reference_loss(emb2, prox2, lab2, float(s2))
    assert jnp.allclose(loss2, ref2_bf16, atol=1e-2, rtol=1e-2), (loss2, ref2_bf16)
    assert jnp.allclose(loss2, ref2_f32, atol=5e-2, rtol=5e-2), (loss2, ref2_f32)

    print("KERNEL_OK")
</pallas_src>

<mosaic_0001>
module attributes {stable_mosaic.version = 11 : i64} {
  func.func @_proxy_nca_kernel(%arg0: i32, %arg1: i32, %arg2: memref<8x128xbf16, #tpu.memory_space<vmem>>, %arg3: memref<32x128xbf16, #tpu.memory_space<vmem>>, %arg4: memref<8x1xi32, #tpu.memory_space<vmem>>, %arg5: memref<8x1xf32, #tpu.memory_space<vmem>>, %arg6: memref<8x1xf32, #tpu.memory_space<vmem>>, %arg7: memref<8x1xf32, #tpu.memory_space<vmem>>, %arg8: memref<8x1xf32, #tpu.memory_space<vmem>>) attributes {dimension_semantics = [#tpu.dimension_semantics<parallel>, #tpu.dimension_semantics<arbitrary>], iteration_bounds = array<i64: 1, 1>, scalar_prefetch = 0 : i64, scratch_operands = 3 : i64, tpu.core_type = #tpu.core_type<tc>, window_params = [{transform_indices = @transform_0, window_bounds = array<i64: 8, 128>}, {transform_indices = @transform_1, window_bounds = array<i64: 32, 128>}, {transform_indices = @transform_2, window_bounds = array<i64: 8, 1>}, {transform_indices = @transform_3, window_bounds = array<i64: 8, 1>}]} {
    %c0_i32 = arith.constant 0 : i32
    %0 = arith.cmpi eq, %arg1, %c0_i32 : i32
    %1 = arith.extui %0 : i1 to i32
    %c0_i32_0 = arith.constant 0 : i32
    %2 = arith.cmpi ne, %1, %c0_i32_0 : i32
    scf.if %2 {
      %cst_24 = arith.constant 0xFF800000 : f32
      %42 = vector.broadcast %cst_24 : f32 to vector<8x1xf32>
      %c0_25 = arith.constant 0 : index
      %c0_26 = arith.constant 0 : index
      %43 = vector.load %arg6[%c0_25, %c0_26] : memref<8x1xf32, #tpu.memory_space<vmem>>, vector<8x1xf32>
      tpu.vector_store %arg6[%c0_25, %c0_26], %42 {strides = array<i32>} : memref<8x1xf32, #tpu.memory_space<vmem>>, vector<8x1xf32>,
      %cst_27 = arith.constant 0.000000e+00 : f32
      %44 = vector.broadcast %cst_27 : f32 to vector<8x1xf32>
      %c0_28 = arith.constant 0 : index
      %c0_29 = arith.constant 0 : index
      %45 = vector.load %arg7[%c0_28, %c0_29] : memref<8x1xf32, #tpu.memory_space<vmem>>, vector<8x1xf32>
      tpu.vector_store %arg7[%c0_28, %c0_29], %44 {strides = array<i32>} : memref<8x1xf32, #tpu.memory_space<vmem>>, vector<8x1xf32>,
      %cst_30 = arith.constant 0.000000e+00 : f32
      %46 = vector.broadcast %cst_30 : f32 to vector<8x1xf32>
      %c0_31 = arith.constant 0 : index
      %c0_32 = arith.constant 0 : index
      %47 = vector.load %arg8[%c0_31, %c0_32] : memref<8x1xf32, #tpu.memory_space<vmem>>, vector<8x1xf32>
      tpu.vector_store %arg8[%c0_31, %c0_32], %46 {strides = array<i32>} : memref<8x1xf32, #tpu.memory_space<vmem>>, vector<8x1xf32>,
    } else {
    }
    %c0 = arith.constant 0 : index
    %c0_1 = arith.constant 0 : index
    %3 = vector.load %arg2[%c0, %c0_1] : memref<8x128xbf16, #tpu.memory_space<vmem>>, vector<8x128xbf16>
    %c0_2 = arith.constant 0 : index
    %c0_3 = arith.constant 0 : index
    %4 = vector.load %arg3[%c0_2, %c0_3] : memref<32x128xbf16, #tpu.memory_space<vmem>>, vector<32x128xbf16>
    %cst = arith.constant dense<0.000000e+00> : vector<8x32xf32>
    %5 = tpu.matmul %3, %4, %cst {dimension_numbers = #tpu.dot_dimension_numbers<[1], [1], [0], [0], [0, 0, 1, 0], [], []>} : vector<8x128xbf16>, vector<32x128xbf16>, vector<8x32xf32> -> vector<8x32xf32>
    %6 = tpu.iota {dimensions = array<i32: 1>} : vector<1x32xi32>
    %c0_4 = arith.constant 0 : index
    %c0_5 = arith.constant 0 : index
    %7 = vector.load %arg6[%c0_4, %c0_5] : memref<8x1xf32, #tpu.memory_space<vmem>>, vector<8x1xf32>
    %cst_6 = arith.constant dense<0xFF800000> : vector<8xf32>
    %8 = vector.multi_reduction <maximumf>, %5, %cst_6 [1] : vector<8x32xf32> to vector<8xf32>
    %9 = vector.shape_cast %8 : vector<8xf32> to vector<8x1xf32>
    %10 = arith.maximumf %7, %9 : vector<8x1xf32>
    %11 = vector.broadcast %10 : vector<8x1xf32> to vector<8x32xf32>
    %12 = arith.subf %5, %11 : vector<8x32xf32>
    %13 = arith.truncf %12 : vector<8x32xf32> to vector<8x32xbf16>
    %14 = math.exp %13 : vector<8x32xbf16>
    %15 = arith.extf %14 : vector<8x32xbf16> to vector<8x32xf32>
    %cst_7 = arith.constant dense<0.000000e+00> : vector<8xf32>
    %16 = vector.multi_reduction <add>, %15, %cst_7 [1] : vector<8x32xf32> to vector<8xf32>
    %17 = vector.shape_cast %16 : vector<8xf32> to vector<8x1xf32>
    %18 = arith.subf %7, %10 : vector<8x1xf32>
    %19 = math.exp %18 : vector<8x1xf32>
    %c0_8 = arith.constant 0 : index
    %c0_9 = arith.constant 0 : index
    %20 = vector.load %arg7[%c0_8, %c0_9] : memref<8x1xf32, #tpu.memory_space<vmem>>, vector<8x1xf32>
    %21 = arith.mulf %19, %20 : vector<8x1xf32>
    %22 = arith.addf %21, %17 : vector<8x1xf32>
    %c0_10 = arith.constant 0 : index
    %c0_11 = arith.constant 0 : index
    %23 = vector.load %arg7[%c0_10, %c0_11] : memref<8x1xf32, #tpu.memory_space<vmem>>, vector<8x1xf32>
    tpu.vector_store %arg7[%c0_10, %c0_11], %22 {strides = array<i32>} : memref<8x1xf32, #tpu.memory_space<vmem>>, vector<8x1xf32>,
    %c0_12 = arith.constant 0 : index
    %c0_13 = arith.constant 0 : index
    %24 = vector.load %arg6[%c0_12, %c0_13] : memref<8x1xf32, #tpu.memory_space<vmem>>, vector<8x1xf32>
    tpu.vector_store %arg6[%c0_12, %c0_13], %10 {strides = array<i32>} : memref<8x1xf32, #tpu.memory_space<vmem>>, vector<8x1xf32>,
    %c0_14 = arith.constant 0 : index
    %c0_15 = arith.constant 0 : index
    %25 = vector.load %arg4[%c0_14, %c0_15] : memref<8x1xi32, #tpu.memory_space<vmem>>, vector<8x1xi32>
    %c32_i32 = arith.constant 32 : i32
    %26 = arith.muli %arg1, %c32_i32 : i32
    %27 = vector.broadcast %26 : i32 to vector<8x1xi32>
    %28 = arith.subi %25, %27 : vector<8x1xi32>
    %29 = vector.broadcast %6 : vector<1x32xi32> to vector<8x32xi32>
    %30 = vector.broadcast %28 : vector<8x1xi32> to vector<8x32xi32>
    %31 = arith.cmpi eq, %29, %30 : vector<8x32xi32>
    %c0_16 = arith.constant 0 : index
    %c0_17 = arith.constant 0 : index
    %32 = vector.load %arg8[%c0_16, %c0_17] : memref<8x1xf32, #tpu.memory_space<vmem>>, vector<8x1xf32>
    %cst_18 = arith.constant 0.000000e+00 : f32
    %33 = vector.broadcast %cst_18 : f32 to vector<8x32xf32>
    %34 = arith.select %31, %5, %33 : vector<8x32xi1>, vector<8x32xf32>
    %cst_19 = arith.constant dense<0.000000e+00> : vector<8xf32>
    %35 = vector.multi_reduction <add>, %34, %cst_19 [1] : vector<8x32xf32> to vector<8xf32>
    %36 = vector.shape_cast %35 : vector<8xf32> to vector<8x1xf32>
    %37 = arith.addf %32, %36 : vector<8x1xf32>
    %c0_20 = arith.constant 0 : index
    %c0_21 = arith.constant 0 : index
    %38 = vector.load %arg8[%c0_20, %c0_21] : memref<8x1xf32, #tpu.memory_space<vmem>>, vector<8x1xf32>
    tpu.vector_store %arg8[%c0_20, %c0_21], %37 {strides = array<i32>} : memref<8x1xf32, #tpu.memory_space<vmem>>, vector<8x1xf32>,
    %c0_i32_22 = arith.constant 0 : i32
    %39 = arith.cmpi eq, %arg1, %c0_i32_22 : i32
    %40 = arith.extui %39 : i1 to i32
    %c0_i32_23 = arith.constant 0 : i32
    %41 = arith.cmpi ne, %40, %c0_i32_23 : i32
    scf.if %41 {
      %c0_24 = arith.constant 0 : index
      %c0_25 = arith.constant 0 : index
      %42 = vector.load %arg6[%c0_24, %c0_25] : memref<8x1xf32, #tpu.memory_space<vmem>>, vector<8x1xf32>
      %c0_26 = arith.constant 0 : index
      %c0_27 = arith.constant 0 : index
      %43 = vector.load %arg7[%c0_26, %c0_27] : memref<8x1xf32, #tpu.memory_space<vmem>>, vector<8x1xf32>
      %44 = math.log %43 : vector<8x1xf32>
      %45 = arith.addf %42, %44 : vector<8x1xf32>
      %c0_28 = arith.constant 0 : index
      %c0_29 = arith.constant 0 : index
      %46 = vector.load %arg8[%c0_28, %c0_29] : memref<8x1xf32, #tpu.memory_space<vmem>>, vector<8x1xf32>
      %47 = arith.subf %45, %46 : vector<8x1xf32>
      %c0_30 = arith.constant 0 : index
      %c0_31 = arith.constant 0 : index
      %48 = vector.load %arg5[%c0_30, %c0_31] : memref<8x1xf32, #tpu.memory_space<vmem>>, vector<8x1xf32>
      tpu.vector_store %arg5[%c0_30, %c0_31], %47 {strides = array<i32>} : memref<8x1xf32, #tpu.memory_space<vmem>>, vector<8x1xf32>,
    } else {
    }
    return
  }
  func.func @transform_0(%arg0: i32, %arg1: i32) -> (i32, i32) {
    %c0_i32 = arith.constant 0 : i32
    %c0_i32_0 = arith.constant 0 : i32
    return %arg0, %c0_i32 : i32, i32
  }
  func.func @transform_1(%arg0: i32, %arg1: i32) -> (i32, i32) {
    %c0_i32 = arith.constant 0 : i32
    %c0_i32_0 = arith.constant 0 : i32
    return %arg1, %c0_i32 : i32, i32
  }
  func.func @transform_2(%arg0: i32, %arg1: i32) -> (i32, i32) {
    %c0_i32 = arith.constant 0 : i32
    %c0_i32_0 = arith.constant 0 : i32
    return %arg0, %c0_i32 : i32, i32
  }
  func.func @transform_3(%arg0: i32, %arg1: i32) -> (i32, i32) {
    %c0_i32 = arith.constant 0 : i32
    %c0_i32_0 = arith.constant 0 : i32
    return %arg0, %c0_i32 : i32, i32
  }
}

</mosaic_0001>

<bundles_post_ra>
// kernel: tpu_custom_call.1
= control target key start
LH: loop header
LB: loop body
LE: loop exit
PB: predicated region body
PF: predicated region fallthrough
CT: control target
= control target key end

     0   :  { %8 = vsyncpa [#allocation6], 0  ;;  %s406_s0 = inlined_call_operand.hbm [shape: bf16[8,128], index: 0, kind: input, shape index: {}]   ;;  %s407_s1 = inlined_call_operand.hbm [shape: bf16[32,128], index: 1, kind: input, shape index: {}]   ;;  %s408_s2 = inlined_call_operand.hbm [shape: s32[8,1], index: 2, kind: input, shape index: {}]   ;;  %s409_s3 = inlined_call_operand.hbm [shape: f32[8,1], index: 3, kind: output, shape index: {}]  }
   0x1   :  { %9 = vsyncpa [#allocation9], 0 }
   0x2   :  { %10 = vsyncpa [#allocation7], 0  ;;  %s318_s12 = smov [#allocation8]   ;;  %s224_s16 = scalar_lea.hbm %s407_s1, 256 }
   0x3   :  { %s26_s13 = sshll.u32 %s318_s12, 4  ;;  %p225_p0 = scmp.ne.s32.totalorder %s407_s1, %s224_s16  ;;  %s27_s13 = int_to_ptr.vmem [resolvable:$true] %s26_s13 }
   0x4   :  { %p228_p1 = scmp.lt.u32.totalorder %s224_s16, %s407_s1 }
   0x6   :  { %p230_p2 = pnand %p228_p1, %p225_p0 }
   0x8   :  { %233 = shalt.err (!%p230_p2)
}
   0x9   :  { %s234_s21 = scalar_lea.vmem %s27_s13, 256  ;;  %p239_p4 = scmp.lt.s32.totalorder %s27_s13, %s27_s13 }
   0xa   :  { %p235_p3 = scmp.ne.s32.totalorder %s27_s13, %s234_s21  ;;  %p240_p5 = scmp.lt.s32.totalorder %s234_s21, %s234_s21 }
   0xc   :  { %p241_p6 = por %p240_p5, %p239_p4 }
   0xe   :  { %p242_p7 = pnand %p241_p6, %p235_p3 }
  0x10   :  { %245 = shalt.err (!%p242_p7)
}
  0x11   :  { %s319_s22 = smov 64   ;;  %s320_s23 = smov 4  }
  0x12   :  { %32 = dma.hbm_to_vmem [thread:$0]  %s407_s1, 256, %s27_s13, [#allocation9], %s319_s22, %s319_s22, %s320_s23  }
  0x13   :  { %s321_s26 = smov [#allocation5]   ;;  %s322_s28 = smov [#allocation10]  }
  0x14   :  { %s17_s27 = sshll.u32 %s321_s26, 4  ;;  %s39_s29 = sshll.u32 %s322_s28, 4  ;;  %s18_s27 = int_to_ptr.vmem [resolvable:$true] %s17_s27  ;;  %s40_s29 = int_to_ptr.vmem [resolvable:$true] %s39_s29 }
  0x15   :  { %s246_s5 = scalar_lea.hbm %s406_s0, 64 }
  0x16   :  { %p247_p8 = scmp.ne.s32.totalorder %s406_s0, %s246_s5  ;;  %p250_p9 = scmp.lt.u32.totalorder %s246_s5, %s406_s0 }
  0x18   :  { %p252_p10 = pnand %p250_p9, %p247_p8 }
  0x1a   :  { %255 = shalt.err (!%p252_p10)
}
  0x1b   :  { %s256_s1 = scalar_lea.vmem %s18_s27, 64  ;;  %p261_p12 = scmp.lt.s32.totalorder %s18_s27, %s18_s27 }
  0x1c   :  { %p257_p11 = scmp.ne.s32.totalorder %s18_s27, %s256_s1  ;;  %p262_p13 = scmp.lt.s32.totalorder %s256_s1, %s256_s1 }
  0x1e   :  { %p263_p0 = por %p262_p13, %p261_p12 }
  0x20   :  { %p264_p1 = pnand %p263_p0, %p257_p11 }
  0x22   :  { %267 = shalt.err (!%p264_p1)
}
  0x23   :  { %20 = dma.hbm_to_vmem [thread:$0]  %s406_s0, 64, %s18_s27, [#allocation6]  }
  0x24   :  { %s268_s14 = scalar_lea.hbm %s408_s2, 128 }
  0x25   :  { %p269_p2 = scmp.ne.s32.totalorder %s408_s2, %s268_s14  ;;  %p272_p3 = scmp.lt.u32.totalorder %s268_s14, %s408_s2 }
  0x27   :  { %p274_p4 = pnand %p272_p3, %p269_p2 }
  0x29   :  { %277 = shalt.err (!%p274_p4)
}
  0x2a   :  { %s278_s19 = scalar_lea.vmem %s40_s29, 128  ;;  %p283_p6 = scmp.lt.s32.totalorder %s40_s29, %s40_s29 }
  0x2b   :  { %p279_p5 = scmp.ne.s32.totalorder %s40_s29, %s278_s19  ;;  %p284_p7 = scmp.lt.s32.totalorder %s278_s19, %s278_s19 }
  0x2d   :  { %p285_p8 = por %p284_p7, %p283_p6 }
  0x2f   :  { %p286_p9 = pnand %p285_p8, %p279_p5 }
  0x31   :  { %289 = shalt.err (!%p286_p9)
}
  0x32   :  { %42 = dma.hbm_to_vmem [thread:$0]  %s408_s2, 128, %s40_s29, [#allocation9]  }
  0x33   :  { %312 = dma.done.wait [#allocation6], 64  }
  0x34   :  { %313 = vsyncadd [#allocation6], 4294967232 }
  0x35   :  { %314 = dma.done.wait [#allocation9], 384  }
  0x36   :  { %315 = vsyncadd [#allocation9], 4294966912  ;;  %vm57_vm0 = vcmask 7168   ;;  %v323_v0 = vmov 0.0   ;;  %vm324_vm1 = vmmov 0   ;;  %v325_v1 = vmov 0  }
  0x37   :  { %59 = vst.msk [vmem:[#allocation3] sm:$0xff] %vm57_vm0, %v323_v0  ;;  %60 = vst.msk [vmem:[#allocation4] sm:$0xff] %vm57_vm0, %v323_v0  ;;  %196 = vmatprep.subr.bf16.mxu0 %v323_v0  ;;  %200 = vmatprep.mubr.msk.bf16.mxu0 %vm324_vm1, %v323_v0  ;;  %v216_v2 = vld [vmem:[#allocation8] sm:$0xff]   ;;  %v149_v3 = vld [vmem:[#allocation10] sm:$0xff]  ;;  %v326_v6 = vmov -inf   ;;  %vm121_vm2 = vcmask 261120   ;;  %v118_v20 = vlaneseq }
  0x38   :  { %215 = vset.pattern.permute.xlu1 %v325_v1  ;;  %214 = vset.pattern.permute.xlu0 %v325_v1  ;;  %v217_v4 = vld [vmem:[#allocation8 + $0x8] sm:$0xff]   ;;  %v61_v5 = vld [vmem:[#allocation5] sm:$0xf]  ;;  %58 = vst.msk [vmem:[#allocation2] sm:$0xff] %vm57_vm0, %v326_v6  ;;  %s327_s2 = smov [#allocation11]  }
  0x39   :  { %197 = vmatpush3.bf16.xpose.msra.mxu0 %v216_v2  ;;  %154 = vperm.xlu1 %215, %v149_v3   ;;  %v119_v21 = vand.u32 127, %v118_v20  ;;  %s181_s21 = sshll.u32 %s327_s2, 4  ;;  %s182_s21 = int_to_ptr.vmem [resolvable:$true] %s181_s21 }
  0x3a   :  { %198 = vmatprep.subr.bf16.mxu0 %v323_v0  ;;  %s290_s22 = scalar_lea.vmem %s182_s21, 128  ;;  %p295_p11 = scmp.lt.s32.totalorder %s182_s21, %s182_s21 }
  0x3b   :  { %p291_p10 = scmp.ne.s32.totalorder %s182_s21, %s290_s22  ;;  %p296_p12 = scmp.lt.s32.totalorder %s290_s22, %s290_s22 }
  0x3d   :  { %p297_p13 = por %p296_p12, %p295_p11 }
  0x3e   :  { %v143_v30 = vld [vmem:[#allocation3] sm:$0xff]  ;;  %v157_v34 = vld [vmem:[#allocation4] sm:$0xff] }
  0x3f   :  { %v120_v12 = vld [vmem:[#allocation2] sm:$0xff]  ;;  %p298_p0 = pnand %p297_p13, %p291_p10 }
  0x41   :  { %199 = vmatpush3.bf16.xpose.msra.mxu0 %v217_v4 }
  0x48   :  { %201 = vmatmul.mubr.bf16.vlgmr.msra.gmra.mrb[0].mxu0 %v61_v5 }
  0xb8   :  { %v155_v22 = vpop.permute.xlu1 %154 }
  0xb9   :  { %vm156_vm3 = vcmp.eq.s32.totalorder %v119_v21, %v155_v22 }
 0x11b   :  { %v112_v7 = vpop.f32.mrb[0].mxu0 }
 0x11c   :  { %v202_v8 = vpop.f32.mrb[1].mxu0  ;;  %v122_v9 = vsel %vm121_vm2, %v112_v7, -inf  ;;  %v158_v26 = vsel %vm156_vm3, %v112_v7, 0.0 }
 0x11d   :  { %123 = vmax.xlane.f32.xlu0 %v122_v9  ;;  %v115_v10 = vpop.f32.mrb[2].mxu0  ;;  %v159_v27 = vsel %vm121_vm2, %v158_v26, 0.0 }
 0x11e   :  { %v203_v11 = vpop.f32.mrb[3].mxu0 }
 0x1aa   :  { %v124_v13 = vpop.xlane.xlu0 %123 }
 0x1ab   :  { %v125_v14 = vmax.f32 %v120_v12, %v124_v13 }
 0x1ad   :  { %v140_v15 = vsub.f32 %v120_v12, %v125_v14  ;;  %148 = vst.msk [vmem:[#allocation2] sm:$0xff] %vm57_vm0, %v125_v14  ;;  %128 = vperm.xlu0 %214, %v125_v14  }
 0x1af   :  { %v141_v28 = vmul.f32 1.442695, %v140_v15 }
 0x1b4   :  { %v167_v40 = vld [vmem:[#allocation2] sm:$0xff] }
 0x22c   :  { %v129_v16 = vpop.permute.xlu0 %128 }
 0x22d   :  { %v131_v17 = vsub.f32 %v112_v7, %v129_v16 }
 0x22f   :  { %v132_v18 = vpack.c.bf16 %v131_v17, %v131_v17 }
 0x231   :  { %v134_v19 = vmul.bf16 1069105081, %v132_v18 }
 0x233   :  { %218 = vpow.bf16 %v134_v19 }
 0x234   :  { %220 = vpow2.f32 %v141_v28 }
 0x23e   :  { %v219_v23 = vpop.eup %218 }
 0x23f   :  { %v136_v24 = vunpack.c.l.bf16 %v219_v23  ;;  %v221_v29 = vpop.eup %220 }
 0x240   :  { %v144_v31 = vmul.f32 %v221_v29, %v143_v30 }
 0x241   :  { %v137_v25 = vsel %vm121_vm2, %v136_v24, 0.0 }
 0x242   :  { %138 = vadd.xlane.f32.xlu1 %v137_v25 }
 0x246   :  { %160 = vadd.xlane.f32.xlu1 %v159_v27 }
 0x2cf   :  { %v139_v32 = vpop.xlane.xlu1 %138 }
 0x2d0   :  { %v145_v33 = vadd.f32 %v144_v31, %v139_v32 }
 0x2d2   :  { %147 = vst.msk [vmem:[#allocation3] sm:$0xff] %vm57_vm0, %v145_v33 }
 0x2d3   :  { %v161_v35 = vpop.xlane.xlu1 %160 }
 0x2d4   :  { %v162_v36 = vadd.f32 %v161_v35, %v157_v34 }
 0x2d6   :  { %163 = vst.msk [vmem:[#allocation4] sm:$0xff] %vm57_vm0, %v162_v36 }
 0x2d9   :  { %v168_v37 = vld [vmem:[#allocation3] sm:$0xff] }
 0x2da   :  { %222 = vlog2.f32 %v168_v37 }
 0x2dd   :  { %v172_v42 = vld [vmem:[#allocation4] sm:$0xff] }
 0x2e4   :  { %v223_v38 = vpop.eup %222 }
 0x2e5   :  { %v170_v39 = vmul.f32 0.6931472, %v223_v38 }
 0x2e7   :  { %v171_v41 = vadd.f32 %v170_v39, %v167_v40 }
 0x2e9   :  { %v173_v43 = vsub.f32 %v171_v41, %v172_v42 }
 0x2eb   :  { %174 = vst.msk [vmem:[#allocation11] sm:$0xff] %vm57_vm0, %v173_v43 }
 0x2ec   :  { %301 = shalt.err (!%p298_p0)
}
 0x2ed   :  { %s302_s25 = scalar_lea.hbm %s409_s3, 128 }
 0x2ee   :  { %p303_p1 = scmp.ne.s32.totalorder %s409_s3, %s302_s25  ;;  %p306_p2 = scmp.lt.u32.totalorder %s302_s25, %s409_s3 }
 0x2f0   :  { %p308_p3 = pnand %p306_p2, %p303_p1 }
 0x2f2   :  { %311 = shalt.err (!%p308_p3)
}
 0x2f3   :  { %184 = dma.vmem_to_hbm [thread:$0]  %s182_s21, 128, %s409_s3, [#allocation7]  }
 0x2f4   :  { %316 = dma.done.wait [#allocation7], 128  }
 0x2f5   :  { %317 = vsyncadd [#allocation7], 4294967168 }
 0x2f6   :  { %188 = vsyncpa [#allocation6], 1 }
 0x2f7   :  { %189 = vsyncpa [#allocation9], 1 }
 0x2f8   :  { %190 = vsyncpa [#allocation7], 1 }

</bundles_post_ra>
